<compile_context>
chip_gen: v7x
topology: tpu7x:2x2x1
jax: 0.10.0
libtpu: 0.0.40
codegen_flags: <defaults>
</compile_context>

<pallas_src>
import jax
import jax.numpy as jnp
from jax.experimental import pallas as pl
from jax.experimental.pallas import tpu as pltpu


_MAX_HW_TILE = 2048  # spatial (lane) tile of the feature map; multiple of 128


def _pick_hw_tile(hw, max_tile=_MAX_HW_TILE):
    """Return (hw_tile, hw_padded) with hw_tile | hw_padded and lane-legal tile."""
    if hw <= max_tile:
        return hw, hw                      # single full-extent tile
    t = (max_tile // 128) * 128
    while t >= 128:                        # largest 128-multiple dividing hw
        if hw % t == 0:
            return t, hw
        t -= 128
    hw_pad = ((hw + max_tile - 1) // max_tile) * max_tile
    return max_tile, hw_pad                # fall back: zero-pad the spatial dim


def _make_kernel(hw_tile, mxu_dtype, precision):
    def kernel(iota_ref, ind_ref, feat_ref, tgt_ref, msk_ref, out_ref, pred_ref):
        h = pl.program_id(1)

        @pl.when(h == 0)
        def _():
            pred_ref[...] = jnp.zeros_like(pred_ref)

        # One-hot for this spatial tile: onehot[p, k] = (p + h*hw_tile == ind[k]).
        # iota is a resident constant input; only compare + cast run per step.
        local_ind = ind_ref[0] - h * hw_tile                        # (1, K) int32
        onehot = (iota_ref[...] == local_ind).astype(mxu_dtype)     # (HW_TILE, K)

        # Partial gather on the MXU: pred[c, k] += feat[c, p] * onehot[p, k].
        feat = feat_ref[0].astype(mxu_dtype)                        # (C, HW_TILE)
        pred_ref[...] += jnp.dot(feat, onehot,
                                 preferred_element_type=jnp.float32,
                                 precision=precision)

        @pl.when(h == pl.num_programs(1) - 1)
        def _():
            t = tgt_ref[0].astype(jnp.float32)                      # (C, K)
            m = jnp.abs(msk_ref[0])                                 # (C, K) f32
            # |pred*m - t*m| == |pred - t| * |m|   (mask multiply folded)
            out_ref[0] = jnp.abs(pred_ref[...] - t) * m

    return kernel


@jax.jit
def reg_weighted_l1_loss(output, mask, ind, target):
    """Pallas implementation of RegWeightedL1Loss.forward(output, mask, ind, target).

    output: (B, C, H, W)   feature map
    mask:   (B, K, C)      float/bool weights (same shape as target)
    ind:    (B, K)         int indices into the flattened H*W spatial grid
    target: (B, K, C)      regression targets
    Returns a scalar f32 loss.
    """
    B, C, H, W = output.shape
    K = ind.shape[1]
    HW = H * W
    hw_tile, hw_pad = _pick_hw_tile(HW)
    n_h = hw_pad // hw_tile

    # f32 inputs need an exact (multi-pass) MXU selection; bf16 stays narrow.
    exact = output.dtype == jnp.float32
    mxu_dtype = jnp.float32 if exact else jnp.bfloat16
    precision = jax.lax.Precision.HIGHEST if exact else jax.lax.Precision.DEFAULT

    # Free contiguous reshape (no transpose copy of the big tensor).
    feat = output.reshape(B, C, HW)
    if hw_pad != HW:
        # Padded columns can never match a valid index -> contribute 0.
        feat = jnp.pad(feat, ((0, 0), (0, 0), (0, hw_pad - HW)))

    mask_f = mask.astype(jnp.float32)
    # Tiny (B*K*C) transposes so K sits on the lane dimension.
    tgt_t = jnp.transpose(target, (0, 2, 1))                 # (B, C, K)
    msk_t = jnp.transpose(mask_f, (0, 2, 1))                 # (B, C, K) f32
    ind_r = ind.astype(jnp.int32).reshape(B, 1, K)           # (B, 1, K)
    # Grid-invariant iota for the one-hot build (DMA'd once, stays resident).
    iota = jnp.broadcast_to(
        jnp.arange(hw_tile, dtype=jnp.int32)[:, None], (hw_tile, K))

    itemsize = jnp.dtype(output.dtype).itemsize
    cost = pl.CostEstimate(
        flops=(2 * B * C * hw_pad * K          # one-hot matmul MACs
               + 2 * B * hw_pad * K            # one-hot compare + cast
               + 3 * B * C * K),               # finalize
        transcendentals=0,
        bytes_accessed=(B * C * hw_pad * itemsize
                        + B * C * K * (jnp.dtype(target.dtype).itemsize + 4)
                        + B * K * 4 + hw_tile * K * 4
                        + B * C * K * 4),
    )

    kernel = _make_kernel(hw_tile, mxu_dtype, precision)

    absdiff = pl.pallas_call(
        kernel,
        out_shape=jax.ShapeDtypeStruct((B, C, K), jnp.float32),
        grid_spec=pltpu.PrefetchScalarGridSpec(
            num_scalar_prefetch=0,
            grid=(B, n_h),
            in_specs=[
                pl.BlockSpec((hw_tile, K), lambda b, h: (0, 0)),        # iota
                pl.BlockSpec((1, 1, K), lambda b, h: (b, 0, 0)),        # ind
                pl.BlockSpec((1, C, hw_tile), lambda b, h: (b, 0, h)),  # feat tile
                pl.BlockSpec((1, C, K), lambda b, h: (b, 0, 0)),        # target
                pl.BlockSpec((1, C, K), lambda b, h: (b, 0, 0)),        # mask
            ],
            out_specs=pl.BlockSpec((1, C, K), lambda b, h: (b, 0, 0)),
            scratch_shapes=[pltpu.VMEM((C, K), jnp.float32)],           # pred acc
        ),
        compiler_params=pltpu.CompilerParams(
            # Batch elements are independent (megacore-parallel on v7x);
            # the spatial tile axis carries the (C, K) pred accumulator.
            dimension_semantics=("parallel", "arbitrary")),
        cost_estimate=cost,
    )(iota, ind_r, feat, tgt_t, msk_t)

    # Tiny scalar reductions stay in XLA so the kernel has no cross-batch carry.
    return jnp.sum(absdiff) / (jnp.sum(mask_f) + 0.0001)


def _reg_weighted_l1_ref(output, mask, ind, target):
    """Pure-JAX reference matching the PyTorch module exactly."""
    B, C, H, W = output.shape
    feat = jnp.transpose(output, (0, 2, 3, 1)).reshape(B, H * W, C)
    pred = jnp.take_along_axis(feat, ind[..., None].astype(jnp.int32), axis=1)
    m = mask.astype(jnp.float32)
    loss = jnp.sum(jnp.abs(pred * m - target * m))
    return loss / (m.sum() + 0.0001)


if __name__ == "__main__":
    key = jax.random.PRNGKey(0)
    k_out, k_ind, k_tgt, k_msk = jax.random.split(key, 4)

    B, C, H, W, K = 2, 4, 16, 16, 8   # batch, regression channels, spatial, max objects

    output = jax.random.normal(k_out, (B, C, H, W), jnp.float32)
    ind = jax.random.randint(k_ind, (B, K), 0, H * W, dtype=jnp.int32)
    target = jax.random.normal(k_tgt, (B, K, C), jnp.float32)
    # Per-object validity expanded over the C regression channels.
    obj_valid = (jax.random.uniform(k_msk, (B, K)) > 0.3).astype(jnp.float32)
    mask = jnp.repeat(obj_valid[:, :, None], C, axis=2)      # (B, K, C)

    loss = reg_weighted_l1_loss(output, mask, ind, target)
    jax.block_until_ready(loss)

    ref = _reg_weighted_l1_ref(output, mask, ind, target)
    assert jnp.allclose(loss, ref, rtol=1e-5, atol=1e-5), (loss, ref)

    print("KERNEL_OK")
</pallas_src>

<mosaic_0001>
module attributes {stable_mosaic.version = 11 : i64} {
  func.func @kernel(%arg0: i32, %arg1: i32, %arg2: memref<256x8xi32, #tpu.memory_space<vmem>>, %arg3: memref<1x1x8xi32, #tpu.memory_space<vmem>>, %arg4: memref<1x4x256xf32, #tpu.memory_space<vmem>>, %arg5: memref<1x4x8xf32, #tpu.memory_space<vmem>>, %arg6: memref<1x4x8xf32, #tpu.memory_space<vmem>>, %arg7: memref<1x4x8xf32, #tpu.memory_space<vmem>>, %arg8: memref<4x8xf32, #tpu.memory_space<vmem>>) attributes {dimension_semantics = [#tpu.dimension_semantics<parallel>, #tpu.dimension_semantics<arbitrary>], iteration_bounds = array<i64: 2, 1>, scalar_prefetch = 0 : i64, scratch_operands = 1 : i64, tpu.core_type = #tpu.core_type<tc>, window_params = [{pipeline_mode = #tpu.pipeline_mode<synchronous>, transform_indices = @transform_0, window_bounds = array<i64: 256, 8>}, {transform_indices = @transform_1, window_bounds = array<i64: 1, 1, 8>}, {transform_indices = @transform_2, window_bounds = array<i64: 1, 4, 256>}, {transform_indices = @transform_3, window_bounds = array<i64: 1, 4, 8>}, {transform_indices = @transform_4, window_bounds = array<i64: 1, 4, 8>}, {transform_indices = @transform_5, window_bounds = array<i64: 1, 4, 8>}]} {
    %c0_i32 = arith.constant 0 : i32
    %0 = arith.cmpi eq, %arg1, %c0_i32 : i32
    %1 = arith.extui %0 : i1 to i32
    %c0_i32_0 = arith.constant 0 : i32
    %2 = arith.cmpi ne, %1, %c0_i32_0 : i32
    scf.if %2 {
      %cst_14 = arith.constant 0.000000e+00 : f32
      %22 = vector.broadcast %cst_14 : f32 to vector<4x8xf32>
      %c0_15 = arith.constant 0 : index
      %c0_16 = arith.constant 0 : index
      %23 = vector.load %arg8[%c0_15, %c0_16] : memref<4x8xf32, #tpu.memory_space<vmem>>, vector<4x8xf32>
      tpu.vector_store %arg8[%c0_15, %c0_16], %22 {strides = array<i32>} : memref<4x8xf32, #tpu.memory_space<vmem>>, vector<4x8xf32>,
    } else {
    }
    %c0 = arith.constant 0 : index
    %c0_1 = arith.constant 0 : index
    %c0_2 = arith.constant 0 : index
    %3 = vector.load %arg3[%c0, %c0_1, %c0_2] : memref<1x1x8xi32, #tpu.memory_space<vmem>>, vector<1x1x8xi32>
    %4 = vector.shape_cast %3 : vector<1x1x8xi32> to vector<1x8xi32>
    %c256_i32 = arith.constant 256 : i32
    %5 = arith.muli %arg1, %c256_i32 : i32
    %6 = vector.broadcast %5 : i32 to vector<1x8xi32>
    %7 = arith.subi %4, %6 : vector<1x8xi32>
    %c0_3 = arith.constant 0 : index
    %c0_4 = arith.constant 0 : index
    %8 = vector.load %arg2[%c0_3, %c0_4] : memref<256x8xi32, #tpu.memory_space<vmem>>, vector<256x8xi32>
    %9 = vector.broadcast %7 : vector<1x8xi32> to vector<256x8xi32>
    %10 = arith.cmpi eq, %8, %9 : vector<256x8xi32>
    %11 = arith.extui %10 : vector<256x8xi1> to vector<256x8xi32>
    %12 = arith.sitofp %11 : vector<256x8xi32> to vector<256x8xf32>
    %c0_5 = arith.constant 0 : index
    %c0_6 = arith.constant 0 : index
    %c0_7 = arith.constant 0 : index
    %13 = vector.load %arg4[%c0_5, %c0_6, %c0_7] : memref<1x4x256xf32, #tpu.memory_space<vmem>>, vector<1x4x256xf32>
    %14 = vector.shape_cast %13 : vector<1x4x256xf32> to vector<4x256xf32>
    %c0_8 = arith.constant 0 : index
    %c0_9 = arith.constant 0 : index
    %15 = vector.load %arg8[%c0_8, %c0_9] : memref<4x8xf32, #tpu.memory_space<vmem>>, vector<4x8xf32>
    %cst = arith.constant dense<0.000000e+00> : vector<4x8xf32>
    %16 = tpu.matmul %14, %12, %cst {dimension_numbers = #tpu.dot_dimension_numbers<[1], [0], [0], [1], [0, 0, 1, 1], [], []>, precision = #tpu.contract_precision<fp32>} : vector<4x256xf32>, vector<256x8xf32>, vector<4x8xf32> -> vector<4x8xf32>
    %17 = arith.addf %15, %16 : vector<4x8xf32>
    %c0_10 = arith.constant 0 : index
    %c0_11 = arith.constant 0 : index
    %18 = vector.load %arg8[%c0_10, %c0_11] : memref<4x8xf32, #tpu.memory_space<vmem>>, vector<4x8xf32>
    tpu.vector_store %arg8[%c0_10, %c0_11], %17 {strides = array<i32>} : memref<4x8xf32, #tpu.memory_space<vmem>>, vector<4x8xf32>,
    %c0_i32_12 = arith.constant 0 : i32
    %19 = arith.cmpi eq, %arg1, %c0_i32_12 : i32
    %20 = arith.extui %19 : i1 to i32
    %c0_i32_13 = arith.constant 0 : i32
    %21 = arith.cmpi ne, %20, %c0_i32_13 : i32
    scf.if %21 {
      %c0_14 = arith.constant 0 : index
      %c0_15 = arith.constant 0 : index
      %c0_16 = arith.constant 0 : index
      %22 = vector.load %arg5[%c0_14, %c0_15, %c0_16] : memref<1x4x8xf32, #tpu.memory_space<vmem>>, vector<1x4x8xf32>
      %23 = vector.shape_cast %22 : vector<1x4x8xf32> to vector<4x8xf32>
      %c0_17 = arith.constant 0 : index
      %c0_18 = arith.constant 0 : index
      %c0_19 = arith.constant 0 : index
      %24 = vector.load %arg6[%c0_17, %c0_18, %c0_19] : memref<1x4x8xf32, #tpu.memory_space<vmem>>, vector<1x4x8xf32>
      %25 = vector.shape_cast %24 : vector<1x4x8xf32> to vector<4x8xf32>
      %26 = math.absf %25 : vector<4x8xf32>
      %c0_20 = arith.constant 0 : index
      %c0_21 = arith.constant 0 : index
      %27 = vector.load %arg8[%c0_20, %c0_21] : memref<4x8xf32, #tpu.memory_space<vmem>>, vector<4x8xf32>
      %28 = arith.subf %27, %23 : vector<4x8xf32>
      %29 = math.absf %28 : vector<4x8xf32>
      %30 = arith.mulf %29, %26 : vector<4x8xf32>
      %c0_22 = arith.constant 0 : index
      %c0_23 = arith.constant 0 : index
      %c0_24 = arith.constant 0 : index
      %31 = vector.load %arg7[%c0_22, %c0_23, %c0_24] : memref<1x4x8xf32, #tpu.memory_space<vmem>>, vector<1x4x8xf32>
      %32 = vector.shape_cast %31 : vector<1x4x8xf32> to vector<4x8xf32>
      %33 = vector.shape_cast %30 : vector<4x8xf32> to vector<1x4x8xf32>
      tpu.vector_store %arg7[%c0_22, %c0_23, %c0_24], %33 {strides = array<i32>} : memref<1x4x8xf32, #tpu.memory_space<vmem>>, vector<1x4x8xf32>,
    } else {
    }
    return
  }
  func.func @transform_0(%arg0: i32, %arg1: i32) -> (i32, i32) {
    %c0_i32 = arith.constant 0 : i32
    %c0_i32_0 = arith.constant 0 : i32
    %c0_i32_1 = arith.constant 0 : i32
    return %c0_i32, %c0_i32_0 : i32, i32
  }
  func.func @transform_1(%arg0: i32, %arg1: i32) -> (i32, i32, i32) {
    %c0_i32 = arith.constant 0 : i32
    %c0_i32_0 = arith.constant 0 : i32
    %c0_i32_1 = arith.constant 0 : i32
    return %arg0, %c0_i32, %c0_i32_0 : i32, i32, i32
  }
  func.func @transform_2(%arg0: i32, %arg1: i32) -> (i32, i32, i32) {
    %c0_i32 = arith.constant 0 : i32
    %c0_i32_0 = arith.constant 0 : i32
    return %arg0, %c0_i32, %arg1 : i32, i32, i32
  }
  func.func @transform_3(%arg0: i32, %arg1: i32) -> (i32, i32, i32) {
    %c0_i32 = arith.constant 0 : i32
    %c0_i32_0 = arith.constant 0 : i32
    %c0_i32_1 = arith.constant 0 : i32
    return %arg0, %c0_i32, %c0_i32_0 : i32, i32, i32
  }
  func.func @transform_4(%arg0: i32, %arg1: i32) -> (i32, i32, i32) {
    %c0_i32 = arith.constant 0 : i32
    %c0_i32_0 = arith.constant 0 : i32
    %c0_i32_1 = arith.constant 0 : i32
    return %arg0, %c0_i32, %c0_i32_0 : i32, i32, i32
  }
  func.func @transform_5(%arg0: i32, %arg1: i32) -> (i32, i32, i32) {
    %c0_i32 = arith.constant 0 : i32
    %c0_i32_0 = arith.constant 0 : i32
    %c0_i32_1 = arith.constant 0 : i32
    return %arg0, %c0_i32, %c0_i32_0 : i32, i32, i32
  }
}

</mosaic_0001>

<bundles_post_ra>
// kernel: reg_weighted_l1_loss.1
= control target key start
LH: loop header
LB: loop body
LE: loop exit
PB: predicated region body
PF: predicated region fallthrough
CT: control target
= control target key end

     0   :  { %s2049_s18 = smov 0   ;;  %s2051_s19 = smov 0   ;;  %s2804_s0 = inlined_call_operand.vmem [shape: s32[256,8], index: 0, kind: input, shape index: {}]   ;;  %s2805_s1 = inlined_call_operand.vmem [shape: s32[2,1,8], index: 1, kind: input, shape index: {}]   ;;  %s2806_s2 = inlined_call_operand.vmem [shape: f32[2,4,256], index: 2, kind: input, shape index: {}]   ;;  %s2807_s3 = inlined_call_operand.vmem [shape: f32[2,4,8], index: 3, kind: input, shape index: {}]   ;;  %s2808_s4 = inlined_call_operand.vmem [shape: f32[2,4,8], index: 4, kind: input, shape index: {}]   ;;  %s2809_s5 = inlined_call_operand.vmem [shape: f32[2,4,8], index: 5, kind: output, shape index: {}]  }
   0x1   :  { %s2053_s20 = smov 0  }
   0x2 LB: > { %s27_s21 = sadd.s32 1, %s2011_s19  ;;  %p1426_p0 = scmp.ge.s32.totalorder %s2015_s20, 1  ;;  %s2015_s20 = sphi %s2053_s20, %s15_s20   ;;  %s2011_s19 = sphi %s2051_s19, %s2944_s19   ;;  %s2007_s18 = sphi %s2049_s18, %s2943_s18  }
   0x3   : > { %p29_p1 = scmp.ge.s32.totalorder %s27_s21, 2  ;;  %p232_p2 = scmp.lt.s32.totalorder %s2015_s20, 3 }
   0x5   : > { %s2946_s21 = smov (%p29_p1, %s27_s21), 0  ;;  %p233_p3 = pnand %p1426_p0, %p232_p2 }
   0x7   : > { %236 = sbr.rel (%p233_p3) target bundleno = 382 (0x17e), region = 40 }
   0xe   : > { %p274_p4 = scmp.lt.s32.totalorder %s2007_s18, 1  ;;  %v325_v0 = vld [vmem:[%s2804_s0 + $0x80] sm:$0xff]  ;;  %v326_v1 = vld [vmem:[%s2804_s0 + $0x88] sm:$0xff]  ;;  %v327_v5 = vld [vmem:[%s2804_s0 + $0x90] sm:$0xff]  ;;  %v2833_v9 = vmov 0.0  }
   0xf   : > { %v309_v2 = vld [vmem:[%s2804_s0] sm:$0xff]  ;;  %v310_v3 = vld [vmem:[%s2804_s0 + $0x8] sm:$0xff]  ;;  %v328_v6 = vld [vmem:[%s2804_s0 + $0x98] sm:$0xff]  ;;  %v2834_v14 = vmov 1.0|1.0  }
  0x10   : > { %s2948_s18 = smov (!%p274_p4, %s2007_s18), 1  ;;  %v311_v7 = vld [vmem:[%s2804_s0 + $0x10] sm:$0xff]  ;;  %v312_v8 = vld [vmem:[%s2804_s0 + $0x18] sm:$0xff]  ;;  %v329_v20 = vld [vmem:[%s2804_s0 + $0xa0] sm:$0xff] }
  0x11   : > { %s276_s7 = scalar_lea.vmem %s2805_s1, %s2948_s18  ;;  %v330_v21 = vld [vmem:[%s2804_s0 + $0xa8] sm:$0xff]  ;;  %v313_v22 = vld [vmem:[%s2804_s0 + $0x20] sm:$0xff]  ;;  %v331_v34 = vld [vmem:[%s2804_s0 + $0xb0] sm:$0xff]  ;;  %s1563_s22 = sshll.u32 %s2948_s18, 3 }
  0x12   : > { %v2085_v4 = vld [vmem:[%s276_s7] ss:$0 sm:$0xff]  ;;  %v314_v23 = vld [vmem:[%s2804_s0 + $0x28] sm:$0xff]  ;;  %v332_v35 = vld [vmem:[%s2804_s0 + $0xb8] sm:$0xff]  ;;  %s285_s29 = scalar_lea.vmem %s2806_s2, %s1563_s22  ;;  %s1429_s30 = sshll.u32 %s2948_s18, 2 }
  0x13   : > { %vm361_vm0 = vcmp.eq.s32.totalorder %v325_v0, %v2085_v4  ;;  %vm362_vm1 = vcmp.eq.s32.totalorder %v326_v1, %v2085_v4  ;;  %vm345_vm2 = vcmp.eq.s32.totalorder %v309_v2, %v2085_v4  ;;  %vm346_vm3 = vcmp.eq.s32.totalorder %v310_v3, %v2085_v4  ;;  %v315_v41 = vld [vmem:[%s2804_s0 + $0x30] sm:$0xff]  ;;  %v316_v42 = vld [vmem:[%s2804_s0 + $0x38] sm:$0xff]  ;;  %v333_v2 = vld [vmem:[%s2804_s0 + $0xc0] sm:$0xff]  ;;  %s290_s8 = scalar_lea.vmem %s2807_s3, %s1429_s30  ;;  %s294_s11 = scalar_lea.vmem %s2808_s4, %s1429_s30 }
  0x14   : > { %v1449_v10 = vsel %vm361_vm0, 1.0, %v2833_v9  ;;  %v1450_v11 = vsel %vm362_vm1, 1.0, %v2833_v9  ;;  %vm2105_vm4 = vmpackc.low %vm362_vm1, %vm361_vm0  ;;  %v1433_v13 = vsel %vm345_vm2, 1.0, %v2833_v9  ;;  %v1434_v17 = vsel %vm346_vm3, 1.0, %v2833_v9  ;;  %v334_v3 = vld [vmem:[%s2804_s0 + $0xc8] sm:$0xff]  ;;  %s298_s18 = scalar_lea.vmem %s2809_s5, %s1429_s30 }
  0x15   : > { %1775 = vmatprep.subr.msk.bf16.mxu0 %vm2105_vm4, %v2834_v14  ;;  %v2115_v15 = vsub.f32 %v1449_v10, %v1449_v10  ;;  %v2117_v16 = vsub.f32 %v1450_v11, %v1450_v11  ;;  %vm2122_vm5 = vmpackc.low %vm346_vm3, %vm345_vm2  ;;  %v2126_v19 = vsub.f32 %v1433_v13, %v1433_v13  ;;  %vm363_vm6 = vcmp.eq.s32.totalorder %v327_v5, %v2085_v4 }
  0x16   : > { %1777 = vmatpush3.bf16.msk.msra.mxu0 %vm2122_vm5, %v2834_v14  ;;  %vm364_vm7 = vcmp.eq.s32.totalorder %v328_v6, %v2085_v4  ;;  %vm347_vm8 = vcmp.eq.s32.totalorder %v311_v7, %v2085_v4  ;;  %vm348_vm9 = vcmp.eq.s32.totalorder %v312_v8, %v2085_v4  ;;  %v1451_v24 = vsel %vm363_vm6, 1.0, %v2833_v9 }
  0x17   : > { %v1452_v25 = vsel %vm364_vm7, 1.0, %v2833_v9  ;;  %vm2149_vm10 = vmpackc.low %vm364_vm7, %vm363_vm6  ;;  %v1435_v27 = vsel %vm347_vm8, 1.0, %v2833_v9  ;;  %v1436_v28 = vsel %vm348_vm9, 1.0, %v2833_v9  ;;  %v2155_v29 = vsub.f32 %v1434_v17, %v1434_v17 }
  0x18   : > { %1779 = vmatprep.subr.msk.bf16.mxu0 %vm2149_vm10, %v2834_v14  ;;  %v2160_v30 = vsub.f32 %v1451_v24, %v1451_v24  ;;  %v2162_v31 = vsub.f32 %v1452_v25, %v1452_v25  ;;  %vm2164_vm11 = vmpackc.low %vm348_vm9, %vm347_vm8  ;;  %v2168_v33 = vsub.f32 %v1435_v27, %v1435_v27  ;;  %vm365_vm12 = vcmp.eq.s32.totalorder %v329_v20, %v2085_v4 }
  0x19   : > { %vm366_vm13 = vcmp.eq.s32.totalorder %v330_v21, %v2085_v4  ;;  %vm349_vm14 = vcmp.eq.s32.totalorder %v313_v22, %v2085_v4  ;;  %vm350_vm15 = vcmp.eq.s32.totalorder %v314_v23, %v2085_v4  ;;  %v2183_v36 = vsub.f32 %v1436_v28, %v1436_v28  ;;  %v317_v22 = vld [vmem:[%s2804_s0 + $0x40] sm:$0xff] }
  0x1a   : > { %1781 = vmatpush3.bf16.msk.msra.mxu0 %vm2164_vm11, %v2834_v14  ;;  %v1453_v37 = vsel %vm365_vm12, 1.0, %v2833_v9  ;;  %v1454_v38 = vsel %vm366_vm13, 1.0, %v2833_v9  ;;  %vm2187_vm0 = vmpackc.low %vm366_vm13, %vm365_vm12  ;;  %v1437_v40 = vsel %vm349_vm14, 1.0, %v2833_v9  ;;  %v1438_v45 = vsel %vm350_vm15, 1.0, %v2833_v9 }
  0x1b   : > { %1783 = vmatprep.subr.msk.bf16.mxu0 %vm2187_vm0, %v2834_v14  ;;  %v2203_v43 = vsub.f32 %v1453_v37, %v1453_v37  ;;  %v2205_v44 = vsub.f32 %v1454_v38, %v1454_v38  ;;  %vm2214_vm1 = vmpackc.low %vm350_vm15, %vm349_vm14  ;;  %v2218_v47 = vsub.f32 %v1437_v40, %v1437_v40  ;;  %v2838_v48 = vand.u32 4294901760, %v2115_v15 }
  0x1c   : > { %v2832_v49 = vand.u32 4294901760, %v2117_v16  ;;  %v2830_v50 = vand.u32 4294901760, %v2126_v19  ;;  %v2829_v51 = vand.u32 4294901760, %v2155_v29  ;;  %vm367_vm2 = vcmp.eq.s32.totalorder %v331_v34, %v2085_v4  ;;  %v318_v34 = vld [vmem:[%s2804_s0 + $0x48] sm:$0xff] }
  0x1d   : > { %vm368_vm3 = vcmp.eq.s32.totalorder %v332_v35, %v2085_v4  ;;  %vm351_vm6 = vcmp.eq.s32.totalorder %v315_v41, %v2085_v4  ;;  %vm352_vm7 = vcmp.eq.s32.totalorder %v316_v42, %v2085_v4  ;;  %v674_v52 = vsub.f32 %v2115_v15, %v2838_v48 }
  0x1e   : > { %1785 = vmatpush3.bf16.msk.msra.mxu0 %vm2214_vm1, %v2834_v14  ;;  %v681_v53 = vsub.f32 %v2117_v16, %v2832_v49  ;;  %v562_v54 = vsub.f32 %v2126_v19, %v2830_v50  ;;  %v569_v55 = vsub.f32 %v2155_v29, %v2829_v51  ;;  %vm2243_vm8 = vmpackc.low %vm368_vm3, %vm367_vm2  ;;  %v2247_v57 = vsub.f32 %v1438_v45, %v1438_v45 }
  0x1f   : > { %v1455_v58 = vsel %vm367_vm2, 1.0, %v2833_v9  ;;  %v1456_v59 = vsel %vm368_vm3, 1.0, %v2833_v9  ;;  %1787 = vmatprep.subr.msk.bf16.mxu0 %vm2243_vm8, %v2834_v14  ;;  %v1439_v60 = vsel %vm351_vm6, 1.0, %v2833_v9  ;;  %vm2257_vm9 = vmpackc.low %vm352_vm7, %vm351_vm6  ;;  %v675_v62 = vand.u32 4294901760, %v674_v52 }
  0x20   : > { %v682_v63 = vand.u32 4294901760, %v681_v53  ;;  %v563_v0 = vand.u32 4294901760, %v562_v54  ;;  %v570_v1 = vand.u32 4294901760, %v569_v55  ;;  %v2267_v5 = vsub.f32 %v1455_v58, %v1455_v58  ;;  %v335_v55 = vld [vmem:[%s2804_s0 + $0xd0] sm:$0xff]  ;;  %v336_v58 = vld [vmem:[%s2804_s0 + $0xd8] sm:$0xff] }
  0x21   : > { %v2269_v6 = vsub.f32 %v1456_v59, %v1456_v59  ;;  %v1440_v7 = vsel %vm352_vm7, 1.0, %v2833_v9  ;;  %v2274_v8 = vsub.f32 %v1439_v60, %v1439_v60  ;;  %v2828_v13 = vand.u32 4294901760, %v2160_v30 }
  0x22   : > { %v1806_v10 = vpack.c.bf16 %v682_v63, %v675_v62  ;;  %v1808_v11 = vpack.c.bf16 %v570_v1, %v563_v0  ;;  %1789 = vmatpush3.bf16.msk.msra.mxu0 %vm2257_vm9, %v2834_v14  ;;  %v2824_v17 = vand.u32 4294901760, %v2162_v31  ;;  %v2821_v20 = vand.u32 4294901760, %v2168_v33 }
  0x23   : > { %v2820_v21 = vand.u32 4294901760, %v2183_v36  ;;  %vm369_vm12 = vcmp.eq.s32.totalorder %v333_v2, %v2085_v4  ;;  %vm370_vm13 = vcmp.eq.s32.totalorder %v334_v3, %v2085_v4  ;;  %v2288_v23 = vsub.f32 %v1440_v7, %v1440_v7 }
  0x24   : > { %1807 = vmatprep.subr.bf16.mxu1 %v1806_v10  ;;  %v688_v24 = vsub.f32 %v2160_v30, %v2828_v13  ;;  %v695_v25 = vsub.f32 %v2162_v31, %v2824_v17  ;;  %v1457_v27 = vsel %vm369_vm12, 1.0, %v2833_v9  ;;  %vm2297_vm14 = vmpackc.low %vm370_vm13, %vm369_vm12  ;;  %v576_v35 = vsub.f32 %v2168_v33, %v2821_v20  ;;  %v319_v10 = vld [vmem:[%s2804_s0 + $0x50] sm:$0xff] }
  0x25   : > { %1809 = vmatpush3.bf16.msra.mxu1 %v1808_v11  ;;  %v583_v37 = vsub.f32 %v2183_v36, %v2820_v21  ;;  %v1458_v38 = vsel %vm370_vm13, 1.0, %v2833_v9  ;;  %1791 = vmatprep.subr.msk.bf16.mxu0 %vm2297_vm14, %v2834_v14  ;;  %v2819_v40 = vand.u32 4294901760, %v2203_v43  ;;  %v2315_v45 = vsub.f32 %v1457_v27, %v1457_v27 }
  0x26   : > { %v689_v41 = vand.u32 4294901760, %v688_v24  ;;  %v696_v42 = vand.u32 4294901760, %v695_v25  ;;  %vm353_vm15 = vcmp.eq.s32.totalorder %v317_v22, %v2085_v4  ;;  %v577_v52 = vand.u32 4294901760, %v576_v35  ;;  %v320_v24 = vld [vmem:[%s2804_s0 + $0x58] sm:$0xff] }
  0x27   : > { %v584_v53 = vand.u32 4294901760, %v583_v37  ;;  %vm354_vm2 = vcmp.eq.s32.totalorder %v318_v34, %v2085_v4  ;;  %v1441_v54 = vsel %vm353_vm15, 1.0, %v2833_v9  ;;  %v2326_v60 = vsub.f32 %v1458_v38, %v1458_v38 }
  0x28   : > { %v1810_v59 = vpack.c.bf16 %v696_v42, %v689_v41  ;;  %v1442_v62 = vsel %vm354_vm2, 1.0, %v2833_v9  ;;  %vm2329_vm3 = vmpackc.low %vm354_vm2, %vm353_vm15  ;;  %v702_v0 = vsub.f32 %v2203_v43, %v2819_v40  ;;  %v2339_v2 = vsub.f32 %v1441_v54, %v1441_v54 }
  0x29   : > { %v1812_v1 = vpack.c.bf16 %v584_v53, %v577_v52  ;;  %1793 = vmatpush3.bf16.msk.msra.mxu0 %vm2329_vm3, %v2834_v14  ;;  %v2818_v3 = vand.u32 4294901760, %v2205_v44  ;;  %v2814_v7 = vand.u32 4294901760, %v2218_v47  ;;  %v2810_v22 = vand.u32 4294901760, %v2247_v57 }
  0x2a   : > { %1811 = vmatprep.subr.bf16.mxu1 %v1810_v59  ;;  %v703_v11 = vand.u32 4294901760, %v702_v0  ;;  %vm371_vm6 = vcmp.eq.s32.totalorder %v335_v55, %v2085_v4  ;;  %vm372_vm7 = vcmp.eq.s32.totalorder %v336_v58, %v2085_v4  ;;  %v2364_v38 = vsub.f32 %v1442_v62, %v1442_v62  ;;  %v337_v55 = vld [vmem:[%s2804_s0 + $0xe0] sm:$0xff] }
  0x2b   : > { %1813 = vmatpush3.bf16.msra.mxu1 %v1812_v1  ;;  %v709_v25 = vsub.f32 %v2205_v44, %v2818_v3  ;;  %v590_v27 = vsub.f32 %v2218_v47, %v2814_v7  ;;  %v1459_v34 = vsel %vm371_vm6, 1.0, %v2833_v9  ;;  %v1460_v35 = vsel %vm372_vm7, 1.0, %v2833_v9  ;;  %vm2360_vm12 = vmpackc.low %vm372_vm7, %vm371_vm6 }
  0x2c   : > { %v597_v41 = vsub.f32 %v2247_v57, %v2810_v22  ;;  %1795 = vmatprep.subr.msk.bf16.mxu0 %vm2360_vm12, %v2834_v14  ;;  %v2372_v42 = vsub.f32 %v1459_v34, %v1459_v34  ;;  %vm355_vm13 = vcmp.eq.s32.totalorder %v319_v10, %v2085_v4  ;;  %vm356_vm15 = vcmp.eq.s32.totalorder %v320_v24, %v2085_v4  ;;  %v338_v10 = vld [vmem:[%s2804_s0 + $0xe8] sm:$0xff] }
  0x2d   : > { %v710_v52 = vand.u32 4294901760, %v709_v25  ;;  %v591_v53 = vand.u32 4294901760, %v590_v27  ;;  %v1443_v54 = vsel %vm355_vm13, 1.0, %v2833_v9  ;;  %v2380_v59 = vsub.f32 %v1460_v35, %v1460_v35  ;;  %vm2383_vm2 = vmpackc.low %vm356_vm15, %vm355_vm13 }
  0x2e   : > { %v598_v58 = vand.u32 4294901760, %v597_v41  ;;  %v1444_v62 = vsel %vm356_vm15, 1.0, %v2833_v9  ;;  %v2884_v0 = vmov 0  ;;  %v2812_v1 = vand.u32 4294901760, %v2267_v5  ;;  %1797 = vmatpush3.bf16.msk.msra.mxu0 %vm2383_vm2, %v2834_v14 }
  0x2f   : > { %v2885_v0 = vsel %vm2383_vm2, 4294967295, %v2884_v0  ;;  %v1814_v24 = vpack.c.bf16 %v710_v52, %v703_v11  ;;  %v2394_v25 = vsub.f32 %v1443_v54, %v1443_v54  ;;  %v2811_v27 = vand.u32 4294901760, %v2269_v6  ;;  %v321_v11 = vld [vmem:[%s2804_s0 + $0x60] sm:$0xff] }
  0x30   : > { %v2813_v34 = vand.u32 4294901760, %v2274_v8  ;;  %v1816_v35 = vpack.c.bf16 %v598_v58, %v591_v53  ;;  %v716_v41 = vsub.f32 %v2267_v5, %v2812_v1  ;;  %v2817_v22 = vand.u32 4294901760, %v2288_v23 }
  0x31   : > { %vm373_vm6 = vcmp.eq.s32.totalorder %v337_v55, %v2085_v4  ;;  %1815 = vmatprep.subr.bf16.mxu1 %v1814_v24  ;;  %v723_v52 = vsub.f32 %v2269_v6, %v2811_v27  ;;  %vm374_vm7 = vcmp.eq.s32.totalorder %v338_v10, %v2085_v4  ;;  %v322_v55 = vld [vmem:[%s2804_s0 + $0x68] sm:$0xff]  ;;  %v2417_v58 = vsub.f32 %v1444_v62, %v1444_v62 }
  0x32   : > { %v604_v53 = vsub.f32 %v2274_v8, %v2813_v34  ;;  %v1461_v54 = vsel %vm373_vm6, 1.0, %v2833_v9  ;;  %1817 = vmatpush3.bf16.msra.mxu1 %v1816_v35  ;;  %v717_v24 = vand.u32 4294901760, %v716_v41  ;;  %v611_v27 = vsub.f32 %v2288_v23, %v2817_v22  ;;  %vm2423_vm13 = vmpackc.low %vm374_vm7, %vm373_vm6 }
  0x33   : > { %v1462_v1 = vsel %vm374_vm7, 1.0, %v2833_v9  ;;  %v2886_v34 = vmov 0  ;;  %v724_v10 = vand.u32 4294901760, %v723_v52  ;;  %1799 = vmatprep.subr.msk.bf16.mxu0 %vm2423_vm13, %v2834_v14  ;;  %v2430_v62 = vsub.f32 %v1461_v54, %v1461_v54  ;;  %v339_v52 = vld [vmem:[%s2804_s0 + $0xf0] sm:$0xff] }
  0x34   : > { %v2887_v34 = vsel %vm2423_vm13, 4294967295, %v2886_v34  ;;  %v605_v7 = vand.u32 4294901760, %v604_v53  ;;  %vm357_vm15 = vcmp.eq.s32.totalorder %v321_v11, %v2085_v4  ;;  %v612_v35 = vand.u32 4294901760, %v611_v27  ;;  %v340_v53 = vld [vmem:[%s2804_s0 + $0xf8] sm:$0xff] }
  0x35   : > { %2888 = vst [vmem:[#allocation3_spill] sm:$0xff] %v2887_v34  ;;  %vm358_vm2 = vcmp.eq.s32.totalorder %v322_v55, %v2085_v4  ;;  %v1445_v41 = vsel %vm357_vm15, 1.0, %v2833_v9  ;;  %v2823_v22 = vand.u32 4294901760, %v2315_v45  ;;  %v1818_v54 = vpack.c.bf16 %v724_v10, %v717_v24 }
  0x36   : > { %v2443_v3 = vsub.f32 %v1462_v1, %v1462_v1  ;;  %v1446_v27 = vsel %vm358_vm2, 1.0, %v2833_v9  ;;  %vm2446_vm6 = vmpackc.low %vm358_vm2, %vm357_vm15  ;;  %v2889_v11 = vmov 0  ;;  %v2822_v55 = vand.u32 4294901760, %v2326_v60 }
  0x37   : > { %v2890_v11 = vsel %vm2446_vm6, 4294967295, %v2889_v11  ;;  %v1820_v40 = vpack.c.bf16 %v612_v35, %v605_v7  ;;  %1801 = vmatpush3.bf16.msk.msra.mxu0 %vm2446_vm6, %v2834_v14  ;;  %v2454_v21 = vsub.f32 %v1445_v41, %v1445_v41  ;;  %v730_v1 = vsub.f32 %v2315_v45, %v2823_v22  ;;  %1819 = vmatprep.subr.bf16.mxu1 %v1818_v54  ;;  %v323_v7 = vld [vmem:[%s2804_s0 + $0x70] sm:$0xff]  ;;  %v324_v35 = vld [vmem:[%s2804_s0 + $0x78] sm:$0xff] }
  0x38   : > { %2891 = vst [vmem:[#allocation4_spill] sm:$0xff] %v2890_v11  ;;  %v2825_v24 = vand.u32 4294901760, %v2339_v2  ;;  %v737_v10 = vsub.f32 %v2326_v60, %v2822_v55  ;;  %v2831_v20 = vand.u32 4294901760, %v2364_v38  ;;  %vm375_vm2 = vcmp.eq.s32.totalorder %v339_v52, %v2085_v4 }
  0x39   : > { %vm376_vm7 = vcmp.eq.s32.totalorder %v340_v53, %v2085_v4  ;;  %1821 = vmatpush3.bf16.msra.mxu1 %v1820_v40  ;;  %v731_v41 = vand.u32 4294901760, %v730_v1  ;;  %v1463_v53 = vsel %vm375_vm2, 1.0, %v2833_v9  ;;  %v2892_v55 = vmov 0 }
  0x3a   : > { %v618_v52 = vsub.f32 %v2339_v2, %v2825_v24  ;;  %v1464_v54 = vsel %vm376_vm7, 1.0, %v2833_v9  ;;  %vm2480_vm15 = vmpackc.low %vm376_vm7, %vm375_vm2  ;;  %v2484_v22 = vsub.f32 %v1446_v27, %v1446_v27  ;;  %v738_v17 = vand.u32 4294901760, %v737_v10  ;;  %v441_v27 = vld [vmem:[%s285_s29] sm:$0xff] }
  0x3b   : > { %v2893_v55 = vsel %vm2480_vm15, 4294967295, %v2892_v55  ;;  %v625_v40 = vsub.f32 %v2364_v38, %v2831_v20  ;;  %1803 = vmatprep.subr.msk.bf16.mxu0 %vm2480_vm15, %v2834_v14  ;;  %v2492_v1 = vsub.f32 %v1463_v53, %v1463_v53  ;;  %vm359_vm6 = vcmp.eq.s32.totalorder %v323_v7, %v2085_v4 }
  0x3c   : > { %2894 = vst [vmem:[#allocation5_spill] sm:$0xff] %v2893_v55  ;;  %v619_v24 = vand.u32 4294901760, %v618_v52  ;;  %vm360_vm2 = vcmp.eq.s32.totalorder %v324_v35, %v2085_v4  ;;  %v2836_v13 = vand.u32 4294901760, %v2372_v42  ;;  %v1822_v51 = vpack.c.bf16 %v738_v17, %v731_v41 }
  0x3d   : > { %v626_v10 = vand.u32 4294901760, %v625_v40  ;;  %v2497_v50 = vsub.f32 %v1464_v54, %v1464_v54  ;;  %v1447_v20 = vsel %vm359_vm6, 1.0, %v2833_v9  ;;  %vm2500_vm7 = vmpackc.low %vm360_vm2, %vm359_vm6  ;;  %v2895_v49 = vmov 0 }
  0x3e   : > { %v2896_v49 = vsel %vm2500_vm7, 4294967295, %v2895_v49  ;;  %v1448_v53 = vsel %vm360_vm2, 1.0, %v2833_v9  ;;  %1805 = vmatpush3.bf16.msk.msra.mxu0 %vm2500_vm7, %v2834_v14  ;;  %v2508_v4 = vsub.f32 %v1447_v20, %v1447_v20  ;;  %v744_v17 = vsub.f32 %v2372_v42, %v2836_v13  ;;  %1823 = vmatprep.subr.bf16.mxu1 %v1822_v51 }
  0x3f   : > { %2897 = vst [vmem:[#allocation6_spill] sm:$0xff] %v2896_v49  ;;  %v2837_v7 = vand.u32 4294901760, %v2380_v59  ;;  %v1824_v35 = vpack.c.bf16 %v626_v10, %v619_v24  ;;  %v2843_v41 = vand.u32 4294901760, %v2394_v25  ;;  %v2844_v52 = vand.u32 4294901760, %v2417_v58 }
  0x40   : > { %v444_v54 = vcombine.high %v441_v27, %v441_v27  ;;  %v745_v40 = vand.u32 4294901760, %v744_v17  ;;  %v2519_v20 = vand.u32 4294901760, %v441_v27  ;;  %v1838_v14 = vpack.c.bf16 %v2117_v16, %v2115_v15 }
  0x41   : > { %v751_v9 = vsub.f32 %v2380_v59, %v2837_v7  ;;  %1825 = vmatpush3.bf16.msra.mxu1 %v1824_v35  ;;  %v2523_v13 = vsub.f32 %v1448_v53, %v1448_v53  ;;  %v632_v51 = vsub.f32 %v2394_v25, %v2843_v41  ;;  %v639_v24 = vsub.f32 %v2417_v58, %v2844_v52 }
  0x42   : > { %v2531_v10 = vand.u32 4294901760, %v444_v54  ;;  %1839 = vmatprep.subr.bf16.mxu0 %v1838_v14  ;;  %v2534_v7 = vsub.f32 %v441_v27, %v2519_v20  ;;  %v2847_v48 = vand.u32 4294901760, %v2430_v62  ;;  %v2848_v53 = vand.u32 4294901760, %v2443_v3 }
  0x43   : > { %v752_v17 = vand.u32 4294901760, %v751_v9  ;;  %v633_v35 = vand.u32 4294901760, %v632_v51  ;;  %v640_v49 = vand.u32 4294901760, %v639_v24  ;;  %v2849_v41 = vand.u32 4294901760, %v2454_v21 }
  0x44   : > { %2898 = vst [vmem:[#allocation7_spill] sm:$0xff] %v2531_v10  ;;  %2899 = vst [vmem:[#allocation8_spill] sm:$0xff] %v2534_v7  ;;  %v2539_v55 = vsub.f32 %v444_v54, %v2531_v10  ;;  %783 = vmatprep.mubr.f32.mxu1 %v2531_v10  ;;  %v2854_v9 = vand.u32 4294901760, %v2534_v7  ;;  %v758_v14 = vsub.f32 %v2430_v62, %v2847_v48  ;;  %v2856_v10 = vand.u32 4294901760, %v2484_v22 }
  0x45   : > { %v1826_v52 = vpack.c.bf16 %v752_v17, %v745_v40  ;;  %v765_v27 = vsub.f32 %v2443_v3, %v2848_v53  ;;  %v1828_v51 = vpack.c.bf16 %v640_v49, %v633_v35  ;;  %v646_v54 = vsub.f32 %v2454_v21, %v2849_v41 }
  0x46   : > { %v2855_v24 = vand.u32 4294901760, %v2539_v55  ;;  %v551_v40 = vsub.f32 %v2534_v7, %v2854_v9  ;;  %v759_v17 = vand.u32 4294901760, %v758_v14  ;;  %v1840_v35 = vpack.c.bf16 %v2155_v29, %v2126_v19 }
  0x47   : > { %1827 = vmatprep.subr.bf16.mxu1 %v1826_v52  ;;  %v766_v48 = vand.u32 4294901760, %v765_v27  ;;  %v647_v53 = vand.u32 4294901760, %v646_v54  ;;  %v653_v41 = vsub.f32 %v2484_v22, %v2856_v10  ;;  %v2857_v34 = vand.u32 4294901760, %v2492_v1 }
  0x48   : > { %1829 = vmatpush3.bf16.msra.mxu1 %v1828_v51  ;;  %v545_v49 = vsub.f32 %v2539_v55, %v2855_v24  ;;  %v552_v52 = vand.u32 4294901760, %v551_v40  ;;  %v2860_v14 = vand.u32 4294901760, %v2497_v50  ;;  %v2861_v9 = vand.u32 4294901760, %v2508_v4 }
  0x49   : > { %v1830_v11 = vpack.c.bf16 %v766_v48, %v759_v17  ;;  %v654_v51 = vand.u32 4294901760, %v653_v41  ;;  %v666_v24 = vand.u32 4294901760, %v2523_v13  ;;  %v1842_v54 = vpack.c.bf16 %v2162_v31, %v2160_v30 }
  0x4a   : > { %v546_v27 = vand.u32 4294901760, %v545_v49  ;;  %v772_v10 = vsub.f32 %v2492_v1, %v2857_v34  ;;  %v779_v48 = vsub.f32 %v2497_v50, %v2860_v14  ;;  %v660_v41 = vsub.f32 %v2508_v4, %v2861_v9 }
  0x4b   : > { %1831 = vmatprep.subr.bf16.mxu1 %v1830_v11  ;;  %v1832_v40 = vpack.c.bf16 %v654_v51, %v647_v53  ;;  %v667_v11 = vsub.f32 %v2523_v13, %v666_v24  ;;  %v1844_v34 = vpack.c.bf16 %v2183_v36, %v2168_v33  ;;  %v1848_v9 = vpack.c.bf16 %v2247_v57, %v2218_v47 }
  0x4c   : > { %547 = vmatprep.mubr.f32.mxu0 %v546_v27  ;;  %v773_v17 = vand.u32 4294901760, %v772_v10  ;;  %v780_v49 = vand.u32 4294901760, %v779_v48  ;;  %v661_v7 = vand.u32 4294901760, %v660_v41  ;;  %v1846_v27 = vpack.c.bf16 %v2205_v44, %v2203_v43 }
  0x4d   : > { %553 = vmatmul.mubr.f32.vlgmr.msra.gmra.mrb[0].mxu0 %v552_v52  ;;  %1833 = vmatpush3.bf16.msra.mxu1 %v1832_v40  ;;  %v668_v14 = vand.u32 4294901760, %v667_v11  ;;  %v2900_v10 = vand.u32 4294901760, %v2115_v15  ;;  %v2902_v48 = vand.u32 4294901760, %v2126_v19  ;;  %v2904_v41 = vand.u32 4294901760, %v2160_v30 }
  0x4e   : > { %1841 = vmatpush3.bf16.msra.mxu0 %v1840_v35  ;;  %v1834_v53 = vpack.c.bf16 %v780_v49, %v773_v17  ;;  %920 = vmatprep.mubr.f32.mxu0 %v2539_v55  ;;  %v2901_v35 = vand.u32 4294901760, %v2117_v16  ;;  %v2906_v11 = vand.u32 4294901760, %v2168_v33  ;;  %v2907_v17 = vand.u32 4294901760, %v2183_v36 }
  0x4f   : > { %1843 = vmatprep.subr.bf16.mxu0 %v1842_v54  ;;  %v1836_v51 = vpack.c.bf16 %v668_v14, %v661_v7  ;;  %v2903_v54 = vand.u32 4294901760, %v2155_v29  ;;  %v2905_v7 = vand.u32 4294901760, %v2162_v31  ;;  %v2908_v15 = vand.u32 4294901760, %v2203_v43 }
  0x50   : > { %v1902_v52 = vpack.c.bf16 %v2901_v35, %v2900_v10  ;;  %1835 = vmatprep.subr.bf16.mxu1 %v1834_v53  ;;  %v1908_v49 = vpack.c.bf16 %v2907_v17, %v2906_v11  ;;  %v2909_v16 = vand.u32 4294901760, %v2205_v44  ;;  %v2910_v19 = vand.u32 4294901760, %v2218_v47  ;;  %v2925_v11 = vld [vmem:[#allocation4_spill] sm:$0xff] }
  0x51   : > { %v1904_v40 = vpack.c.bf16 %v2903_v54, %v2902_v48  ;;  %v1906_v14 = vpack.c.bf16 %v2905_v7, %v2904_v41  ;;  %1837 = vmatpush3.bf16.msra.mxu1 %v1836_v51  ;;  %v2911_v29 = vand.u32 4294901760, %v2247_v57  ;;  %v2912_v31 = vand.u32 4294901760, %v2267_v5  ;;  %v2924_v7 = vld [vmem:[#allocation8_spill] sm:$0xff] }
  0x52   : > { %v1910_v53 = vpack.c.bf16 %v2909_v16, %v2908_v15  ;;  %1845 = vmatpush3.bf16.msra.mxu0 %v1844_v34  ;;  %v2913_v10 = vand.u32 4294901760, %v2269_v6  ;;  %v2914_v36 = vand.u32 4294901760, %v2274_v8  ;;  %v2915_v35 = vand.u32 4294901760, %v2288_v23  ;;  %v2928_v15 = vld [vmem:[#allocation7_spill] sm:$0xff] }
  0x53   : > { %v1912_v30 = vpack.c.bf16 %v2911_v29, %v2910_v19  ;;  %1847 = vmatprep.subr.bf16.mxu0 %v1846_v27  ;;  %v2916_v44 = vmov 1.0|1.0   ;;  %v1850_v47 = vpack.c.bf16 %v2269_v6, %v2267_v5  ;;  %v2917_v57 = vand.u32 4294901760, %v2315_v45 }
  0x54   : > { %v1914_v33 = vpack.c.bf16 %v2913_v10, %v2912_v31  ;;  %v1916_v43 = vpack.c.bf16 %v2915_v35, %v2914_v36  ;;  %1871 = vmatprep.subr.msk.bf16.mxu1 %vm2105_vm4, %v2916_v44  ;;  %v2918_v34 = vand.u32 4294901760, %v2326_v60  ;;  %v2919_v48 = vand.u32 4294901760, %v2339_v2  ;;  %785 = vmatmul.mubr.f32.vlgmr.msra.gmra.mrb[0].mxu1 %v2519_v20 }
  0x55   : > { %v2920_v54 = vand.u32 4294901760, %v2364_v38  ;;  %1873 = vmatpush3.bf16.msk.msra.mxu1 %vm2122_vm5, %v2916_v44  ;;  %v1852_v5 = vpack.c.bf16 %v2288_v23, %v2274_v8  ;;  %v1854_v6 = vpack.c.bf16 %v2326_v60, %v2315_v45  ;;  %v2921_v27 = vand.u32 4294901760, %v2539_v55 }
  0x56   : > { %v1918_v51 = vpack.c.bf16 %v2918_v34, %v2917_v57  ;;  %1849 = vmatpush3.bf16.msra.mxu0 %v1848_v9  ;;  %1875 = vmatprep.subr.msk.bf16.mxu1 %vm2149_vm10, %v2916_v44  ;;  %v1856_v9 = vpack.c.bf16 %v2364_v38, %v2339_v2  ;;  %v1858_v8 = vpack.c.bf16 %v2380_v59, %v2372_v42  ;;  %v2931_v12 = vand.u32 4294901760, %v2372_v42 }
  0x57   : > { %v1920_v41 = vpack.c.bf16 %v2920_v54, %v2919_v48  ;;  %1851 = vmatprep.subr.bf16.mxu0 %v1850_v47  ;;  %1027 = vmatprep.mubr.f32.mxu1 %v2921_v27  ;;  %v1860_v23 = vpack.c.bf16 %v2417_v58, %v2394_v25  ;;  %v1862_v45 = vpack.c.bf16 %v2443_v3, %v2430_v62  ;;  %v2932_v18 = vand.u32 4294901760, %v2380_v59  ;;  %v1315_v48 = vld [vmem:[%s294_s11] sm:$0xf] }
  0x58   : > { %v1864_v60 = vpack.c.bf16 %v2484_v22, %v2454_v21  ;;  %v1866_v2 = vpack.c.bf16 %v2497_v50, %v2492_v1  ;;  %v1868_v38 = vpack.c.bf16 %v2523_v13, %v2508_v4  ;;  %vm2922_vm6 = vnez %v2885_v0 }
  0x59   : > { %1877 = vmatpush3.bf16.msk.msra.mxu1 %vm2164_vm11, %v2916_v44  ;;  %vm2926_vm2 = vnez %v2925_v11  ;;  %v2933_v26 = vand.u32 4294901760, %v2394_v25  ;;  %v2934_v32 = vand.u32 4294901760, %v2417_v58  ;;  %v2935_v39 = vand.u32 4294901760, %v2430_v62 }
  0x5a   : > { %1853 = vmatpush3.bf16.msra.mxu0 %v1852_v5  ;;  %1879 = vmatprep.subr.msk.bf16.mxu1 %vm2187_vm0, %v2916_v44  ;;  %v2936_v42 = vand.u32 4294901760, %v2443_v3  ;;  %v2937_v46 = vand.u32 4294901760, %v2454_v21  ;;  %v2938_v25 = vand.u32 4294901760, %v2484_v22  ;;  %v2939_v56 = vand.u32 4294901760, %v2492_v1 }
  0x5b   : > { %1855 = vmatprep.subr.bf16.mxu0 %v1854_v6  ;;  %v2940_v3 = vand.u32 4294901760, %v2497_v50  ;;  %v2941_v61 = vand.u32 4294901760, %v2508_v4  ;;  %v2942_v50 = vmov 0.0  }
  0x5c   : > { %v1926_v59 = vpack.c.bf16 %v2936_v42, %v2935_v39  ;;  %v1928_v58 = vpack.c.bf16 %v2938_v25, %v2937_v46 }
  0x5d   : > { %1881 = vmatpush3.bf16.msk.msra.mxu1 %vm2214_vm1, %v2916_v44  ;;  %v1930_v62 = vpack.c.bf16 %v2940_v3, %v2939_v56  ;;  %v1932_v21 = vpack.c.bf16 %v666_v24, %v2941_v61 }
  0x5e   : > { %1857 = vmatpush3.bf16.msra.mxu0 %v1856_v9  ;;  %1883 = vmatprep.subr.msk.bf16.mxu1 %vm2243_vm8, %v2916_v44 }
  0x5f   : > { %1859 = vmatprep.subr.bf16.mxu0 %v1858_v8 }
  0x61   : > { %1885 = vmatpush3.bf16.msk.msra.mxu1 %vm2257_vm9, %v2916_v44 }
  0x62   : > { %1861 = vmatpush3.bf16.msra.mxu0 %v1860_v23  ;;  %1887 = vmatprep.subr.msk.bf16.mxu1 %vm2297_vm14, %v2916_v44 }
  0x63   : > { %1863 = vmatprep.subr.bf16.mxu0 %v1862_v45 }
  0x65   : > { %1889 = vmatpush3.bf16.msk.msra.mxu1 %vm2329_vm3, %v2916_v44 }
  0x66   : > { %1865 = vmatpush3.bf16.msra.mxu0 %v1864_v60  ;;  %1891 = vmatprep.subr.msk.bf16.mxu1 %vm2360_vm12, %v2916_v44 }
  0x67   : > { %1867 = vmatprep.subr.bf16.mxu0 %v1866_v2 }
  0x69   : > { %1893 = vmatpush3.bf16.msk.msra.mxu1 %vm2922_vm6, %v2916_v44 }
  0x6a   : > { %1869 = vmatpush3.bf16.msra.mxu0 %v1868_v38  ;;  %1895 = vmatprep.subr.msk.bf16.mxu1 %vm2423_vm13, %v2916_v44 }
  0x6b   : > { %1903 = vmatprep.subr.bf16.mxu0 %v1902_v52 }
  0x6d   : > { %923 = vmatmul.mubr.f32.vlgmr.msra.gmra.mrb[2].mxu0 %v2924_v7  ;;  %1897 = vmatpush3.bf16.msk.msra.mxu1 %vm2926_vm2, %v2916_v44 }
  0x6e   : > { %1905 = vmatpush3.bf16.msra.mxu0 %v1904_v40  ;;  %1899 = vmatprep.subr.msk.bf16.mxu1 %vm2480_vm15, %v2916_v44  ;;  %v2930_v40 = vand.u32 4294901760, %v2924_v7 }
  0x6f   : > { %1907 = vmatprep.subr.bf16.mxu0 %v1906_v14  ;;  %1197 = vmatprep.mubr.f32.mxu0 %v2928_v15  ;;  %v1922_v14 = vpack.c.bf16 %v2932_v18, %v2931_v12 }
  0x71   : > { %1901 = vmatpush3.bf16.msk.msra.mxu1 %vm2500_vm7, %v2916_v44 }
  0x72   : > { %1909 = vmatpush3.bf16.msra.mxu0 %v1908_v49  ;;  %1935 = vmatprep.subr.msk.bf16.mxu1 %vm2105_vm4, %v2916_v44  ;;  %v1924_v49 = vpack.c.bf16 %v2934_v32, %v2933_v26  ;;  %vm303_vm4 = vcmask 60416  }
  0x73   : > { %1911 = vmatprep.subr.bf16.mxu0 %v1910_v53  ;;  %304 = vst.msk [vmem:[#allocation2] sm:$0xf] %vm303_vm4, %v2942_v50 }
  0x74   : > { %1031 = vmatmul.mubr.f32.vlgmr.msra.gmra.mrb[2].mxu1 %v2930_v40 }
  0x75   : > { %1937 = vmatpush3.bf16.msk.msra.mxu1 %vm2122_vm5, %v2916_v44  ;;  %1301 = vmatprep.mubr.f32.mxu1 %v2928_v15 }
  0x76   : > { %1913 = vmatpush3.bf16.msra.mxu0 %v1912_v30  ;;  %1939 = vmatprep.subr.msk.bf16.mxu1 %vm2149_vm10, %v2916_v44 }
  0x77   : > { %1915 = vmatprep.subr.bf16.mxu0 %v1914_v33 }
  0x79   : > { %1941 = vmatpush3.bf16.msk.msra.mxu1 %vm2164_vm11, %v2916_v44 }
  0x7a   : > { %1917 = vmatpush3.bf16.msra.mxu0 %v1916_v43  ;;  %1943 = vmatprep.subr.msk.bf16.mxu1 %vm2187_vm0, %v2916_v44  ;;  %v442_v47 = vld [vmem:[#allocation2] sm:$0xf] }
  0x7b   : > { %1919 = vmatprep.subr.bf16.mxu0 %v1918_v51  ;;  %v1314_v51 = vld [vmem:[%s290_s8] sm:$0xf] }
  0x7d   : > { %1945 = vmatpush3.bf16.msk.msra.mxu1 %vm2214_vm1, %v2916_v44 }
  0x7e   : > { %1921 = vmatpush3.bf16.msra.mxu0 %v1920_v41  ;;  %1947 = vmatprep.subr.msk.bf16.mxu1 %vm2243_vm8, %v2916_v44  ;;  %v1316_v41 = vand.u32 2147483647, %v1315_v48 }
  0x7f   : > { %1923 = vmatprep.subr.bf16.mxu0 %v1922_v14 }
  0x81   : > { %1949 = vmatpush3.bf16.msk.msra.mxu1 %vm2257_vm9, %v2916_v44 }
  0x82   : > { %1925 = vmatpush3.bf16.msra.mxu0 %v1924_v49  ;;  %1951 = vmatprep.subr.msk.bf16.mxu1 %vm2297_vm14, %v2916_v44 }
  0x83   : > { %1927 = vmatprep.subr.bf16.mxu0 %v1926_v59 }
  0x85   : > { %1953 = vmatpush3.bf16.msk.msra.mxu1 %vm2329_vm3, %v2916_v44 }
  0x86   : > { %1929 = vmatpush3.bf16.msra.mxu0 %v1928_v58  ;;  %1955 = vmatprep.subr.msk.bf16.mxu1 %vm2360_vm12, %v2916_v44 }
  0x87   : > { %1931 = vmatprep.subr.bf16.mxu0 %v1930_v62 }
  0x89   : > { %1957 = vmatpush3.bf16.msk.msra.mxu1 %vm2922_vm6, %v2916_v44 }
  0x8a   : > { %1933 = vmatpush3.bf16.msra.mxu0 %v1932_v21  ;;  %1959 = vmatprep.subr.msk.bf16.mxu1 %vm2423_vm13, %v2916_v44 }
  0x8d   : > { %1199 = vmatmul.mubr.f32.vlgmr.msra.gmra.mrb[4].mxu0 %v2519_v20  ;;  %1961 = vmatpush3.bf16.msk.msra.mxu1 %vm2926_vm2, %v2916_v44 }
  0x8e   : > { %1963 = vmatprep.subr.msk.bf16.mxu1 %vm2480_vm15, %v2916_v44 }
  0x91   : > { %1965 = vmatpush3.bf16.msk.msra.mxu1 %vm2500_vm7, %v2916_v44 }
  0x94   : > { %1303 = vmatmul.mubr.f32.vlgmr.msra.gmra.mrb[4].mxu1 %v2519_v20 }
 0x120   : > { %v1596_v13 = vpop.f32.mrb[0].mxu0 }
 0x121   : > { %v1597_v28 = vpop.f32.mrb[1].mxu0 }
 0x122   : > { %v1598_v63 = vadd.f32 %v1597_v28, %v1596_v13 }
 0x127   : > { %v1631_v22 = vpop.f32.mrb[0].mxu1 }
 0x128   : > { %v1632_v37 = vpop.f32.mrb[1].mxu1 }
 0x129   : > { %v1633_v0 = vadd.f32 %v1632_v37, %v1631_v22 }
 0x12b   : > { %v787_v1 = vadd.f32 %v1633_v0, %v1598_v63 }
 0x140   : > { %v1666_v4 = vpop.f32.mrb[2].mxu0 }
 0x141   : > { %v1667_v24 = vpop.f32.mrb[3].mxu0 }
 0x142   : > { %v1668_v16 = vadd.f32 %v1667_v24, %v1666_v4 }
 0x144   : > { %v925_v53 = vadd.f32 %v1668_v16, %v787_v1 }
 0x147   : > { %v1701_v19 = vpop.f32.mrb[2].mxu1 }
 0x148   : > { %v1702_v29 = vpop.f32.mrb[3].mxu1 }
 0x149   : > { %v1703_v30 = vadd.f32 %v1702_v29, %v1701_v19 }
 0x14b   : > { %v1033_v20 = vadd.f32 %v1703_v30, %v925_v53 }
 0x160   : > { %v1736_v31 = vpop.f32.mrb[4].mxu0 }
 0x161   : > { %v1737_v10 = vpop.f32.mrb[5].mxu0 }
 0x162   : > { %v1738_v33 = vadd.f32 %v1737_v10, %v1736_v31 }
 0x164   : > { %v1201_v36 = vadd.f32 %v1738_v33, %v1033_v20 }
 0x167   : > { %v1771_v35 = vpop.f32.mrb[4].mxu1 }
 0x168   : > { %v1772_v43 = vpop.f32.mrb[5].mxu1 }
 0x169   : > { %v1773_v44 = vadd.f32 %v1772_v43, %v1771_v35 }
 0x16b   : > { %v1305_v57 = vadd.f32 %v1773_v44, %v1201_v36 }
 0x16d   : > { %v1308_v34 = vadd.f32 %v1305_v57, %v442_v47 }
 0x16f   : > { %1310 = vst.msk [vmem:[#allocation2] sm:$0xf] %vm303_vm4, %v1308_v34 }
 0x176   : > { %v1317_v54 = vld [vmem:[#allocation2] sm:$0xf] }
 0x177   : > { %v1318_v5 = vsub.f32 %v1317_v54, %v1314_v51 }
 0x179   : > { %v1319_v6 = vand.u32 2147483647, %v1318_v5 }
 0x17b   : > { %v1320_v27 = vmul.f32 %v1319_v6, %v1316_v41 }
 0x17d   : > { %1321 = vst.msk [vmem:[%s298_s18] sm:$0xf] %vm303_vm4, %v1320_v27 }
 0x17e PF: > { %s15_s20 = sadd.s32 1, %s2015_s20   ;;  %s2943_s18 = smov %s2011_s19 }
 0x17f   : > { %p12_p5 = scmp.ge.s32.totalorder %s15_s20, 4   ;;  %s2944_s19 = smov %s2946_s21 }
 0x181   :  { %14 = sbr.rel (!%p12_p5) target bundleno = 2 (0x2), region = 87 }

</bundles_post_ra>
